<compile_context>
chip_gen: v7x
topology: tpu7x:2x2x1
jax: 0.10.0
libtpu: 0.0.40
codegen_flags: <defaults>
</compile_context>

<pallas_src>
from functools import partial

import jax
import jax.numpy as jnp
from jax.experimental import pallas as pl
from jax.experimental.pallas import tpu as pltpu


# ---------------------------------------------------------------------------
# Fused kernel: student MLP + teacher MLP + KD criterion + top-1 metric
# ---------------------------------------------------------------------------
def _kd_fused_kernel(x_ref, w1_ref, b1_ref, w2s_ref, b2s_ref, w2t_ref, b2t_ref,
                     y_ref, logits_ref, scalars_ref, acc_ref, *, temperature):
    k = pl.program_id(1)

    @pl.when(k == 0)
    def _init():
        acc_ref[...] = jnp.zeros_like(acc_ref)

    # Fused layer-1 partial contraction over this K tile:
    # one (bb, tk) x (tk, 2H) dot covers both student and teacher (bf16 operands,
    # f32 MXU accumulation into a single scratch accumulator).
    xb = x_ref[...].astype(jnp.bfloat16)                               # (bb, tk)
    acc_ref[...] += jnp.dot(xb, w1_ref[...], preferred_element_type=jnp.float32)

    @pl.when(k == pl.num_programs(1) - 1)
    def _finalize():
        H = w2s_ref.shape[0]
        # --- layer 2 (both nets); logits never leave VMEM before the loss ---
        h = jnp.maximum(acc_ref[...] + b1_ref[...], 0.0)               # (bb, 2H)
        h_s = h[:, :H].astype(jnp.bfloat16)                            # lane-aligned slice
        h_t = h[:, H:].astype(jnp.bfloat16)
        s = jnp.dot(h_s, w2s_ref[...],
                    preferred_element_type=jnp.float32) + b2s_ref[...]
        t = jnp.dot(h_t, w2t_ref[...],
                    preferred_element_type=jnp.float32) + b2t_ref[...]
        logits_ref[...] = s.astype(logits_ref.dtype)                   # student logits out

        BB, C = s.shape
        y = y_ref[...]                                                 # (bb, 1) int32 labels
        col = jax.lax.broadcasted_iota(jnp.int32, (BB, C), 1)
        label_mask = (col == y).astype(jnp.float32)                    # in-kernel one-hot

        # --- CE(student, hard label), temperature 1 ---
        s_max = jnp.max(s, axis=-1, keepdims=True)
        lse_s = jnp.log(jnp.sum(jnp.exp(s - s_max), axis=-1, keepdims=True)) + s_max
        log_ps = s - lse_s
        ce_sum = -jnp.sum(label_mask * log_ps)

        # --- KL(softmax(t/T) || softmax(s/T)); reuse s_max/T as the student stabilizer ---
        inv_t = 1.0 / temperature
        sT = s * inv_t
        tT = t * inv_t
        sT_max = s_max * inv_t                                         # monotone scale, no 2nd max
        lse_sT = jnp.log(jnp.sum(jnp.exp(sT - sT_max), axis=-1, keepdims=True)) + sT_max
        log_psT = sT - lse_sT
        tT_max = jnp.max(tT, axis=-1, keepdims=True)
        lse_tT = jnp.log(jnp.sum(jnp.exp(tT - tT_max), axis=-1, keepdims=True)) + tT_max
        log_ptT = tT - lse_tT
        ptT = jnp.exp(log_ptT)                                         # single exp for teacher probs
        kd_sum = jnp.sum(ptT * (log_ptT - log_psT))

        # --- top-1 accuracy (first-occurrence argmax via the row max already computed) ---
        pred = jnp.min(jnp.where(s == s_max, col, C), axis=-1, keepdims=True)
        correct = jnp.sum((pred == y).astype(jnp.float32))

        # Pack the three per-tile partial sums into one lane-dense (1, 128) slab
        # (unmasked vst); the wrapper sums across batch tiles.
        lane = jax.lax.broadcasted_iota(jnp.int32, (1, 128), 1)
        slab = jnp.where(lane == 0, kd_sum,
               jnp.where(lane == 1, ce_sum,
               jnp.where(lane == 2, correct, 0.0)))
        scalars_ref[...] = slab


# ---------------------------------------------------------------------------
# VMEM-aware tiling helpers
# ---------------------------------------------------------------------------
def _vmem_capacity_bytes():
    """Generation-aware VMEM capacity (falls back to v7x's 64 MiB per TensorCore)."""
    try:
        info = pltpu.get_tpu_info()
        cap = getattr(info, "vmem_capacity_bytes", None)
        if cap:
            return int(cap)
    except Exception:
        pass
    return 64 * 1024 * 1024


def _working_set_bytes(tk, block_b, two_h, C, x_itemsize):
    """Estimated VMEM footprint at K-tile size `tk` (includes accumulator scratch and
    the double-buffered resident blocks, per the review's correctness concern)."""
    H = two_h // 2
    resident = (block_b * two_h * 4                    # f32 fused layer-1 accumulator
                + 2 * (2 * H * C * 2                   # both w2 (bf16), double-buffered
                       + two_h * 4 + 2 * C * 4         # fused b1 + both b2 (f32)
                       + block_b * 4                   # labels (int32)
                       + block_b * C * 4               # logits output block (f32)
                       + 128 * 4))                     # scalar slab
    streaming = 2 * (block_b * tk * x_itemsize + tk * two_h * 2)   # x + fused w1, 2-deep
    return resident + streaming


def _pick_block_k(F, block_b, two_h, C, x_itemsize, budget_bytes):
    """Prefer a single grid step (block_k = F); only K-tile when the full problem does
    not fit the per-generation VMEM budget."""
    if _working_set_bytes(F, block_b, two_h, C, x_itemsize) <= budget_bytes:
        return F
    best = None
    tk = 128
    while tk < F:
        if F % tk == 0 and _working_set_bytes(tk, block_b, two_h, C,
                                              x_itemsize) <= budget_bytes:
            best = tk
        tk += 128
    if best is not None:
        return best
    return 128 if F % 128 == 0 else F


def _pick_block_b(B):
    """Batch tile: full batch when small, 256/128-row tiles at realistic sizes so the
    MXU LHS fills and the B grid axis can shard across TensorCores."""
    for cand in (256, 128):
        if B > cand and B % cand == 0:
            return cand
    return B


# ---------------------------------------------------------------------------
# Fused forward wrapper
# ---------------------------------------------------------------------------
def kd_forward_fused(xf, fused_params, labels, *, temperature,
                     block_k=None, block_b=None):
    """One pallas_call: both network forwards + KD criterion + metric reductions."""
    B, F = xf.shape
    w1_cat, b1_cat, w2s, b2s, w2t, b2t = fused_params
    two_h = w1_cat.shape[1]
    H = two_h // 2
    C = w2s.shape[1]

    if block_b is None:
        block_b = _pick_block_b(B)
    num_b = B // block_b

    cap = _vmem_capacity_bytes()
    if block_k is None:
        block_k = _pick_block_k(F, block_b, two_h, C, xf.dtype.itemsize,
                                budget_bytes=int(cap * 0.5))
    if F % block_k != 0:
        block_k = F
    num_k = F // block_k

    # Explicit scoped-VMEM limit: enough for the chosen working set (plus margin),
    # never exceeding 90% of this generation's physical VMEM.
    ws = _working_set_bytes(block_k, block_b, two_h, C, xf.dtype.itemsize)
    vmem_limit = int(min(int(cap * 0.9), max(ws + (8 << 20), 32 << 20)))

    params_bytes = sum(int(p.size) * p.dtype.itemsize for p in fused_params)
    cost = pl.CostEstimate(
        flops=2 * B * F * two_h + 2 * 2 * B * H * C,          # fused layer 1 + both layer 2
        transcendentals=3 * B * C + 3 * B,                    # exp passes + logsumexp logs
        bytes_accessed=int(xf.size) * xf.dtype.itemsize + params_bytes
                       + B * 4 + B * C * 4 + num_b * 128 * 4,
    )

    logits, scalars = pl.pallas_call(
        partial(_kd_fused_kernel, temperature=float(temperature)),
        out_shape=(jax.ShapeDtypeStruct((B, C), jnp.float32),        # student logits
                   jax.ShapeDtypeStruct((num_b, 128), jnp.float32)), # per-tile [kd, ce, correct]
        grid=(num_b, num_k),
        in_specs=[
            pl.BlockSpec((block_b, block_k), lambda b, k: (b, k)),   # x tile
            pl.BlockSpec((block_k, two_h), lambda b, k: (k, 0)),     # fused w1 K-tile (bf16)
            pl.BlockSpec((1, two_h), lambda b, k: (0, 0)),           # fused b1
            pl.BlockSpec((H, C), lambda b, k: (0, 0)),               # student w2 (bf16)
            pl.BlockSpec((1, C), lambda b, k: (0, 0)),               # student b2
            pl.BlockSpec((H, C), lambda b, k: (0, 0)),               # teacher w2 (bf16)
            pl.BlockSpec((1, C), lambda b, k: (0, 0)),               # teacher b2
            pl.BlockSpec((block_b, 1), lambda b, k: (b, 0)),         # labels (int32)
        ],
        out_specs=(pl.BlockSpec((block_b, C), lambda b, k: (b, 0)),
                   pl.BlockSpec((1, 128), lambda b, k: (b, 0))),
        scratch_shapes=[pltpu.VMEM((block_b, two_h), jnp.float32)],  # fused layer-1 accumulator
        compiler_params=pltpu.CompilerParams(
            # B is independent -> "parallel" (shards across v7x's 2 TensorCores);
            # K carries the accumulator -> "arbitrary", kept last.
            dimension_semantics=("parallel", "arbitrary"),
            vmem_limit_bytes=vmem_limit),
        cost_estimate=cost,
    )(xf, w1_cat, b1_cat, w2s, b2s, w2t, b2t, labels)
    return logits, scalars


# ---------------------------------------------------------------------------
# KDModel equivalent
# ---------------------------------------------------------------------------
class KDModelPallas:
    """JAX/Pallas re-implementation of KDModel (eval mode, as set by __init__)."""

    def __init__(self, key, in_features, hidden, num_classes,
                 temperature=4.0, alpha=0.9, block_k=None, block_b=None):
        self.mode = "eval"                  # KDModel.__init__ ends with self.eval()
        self.temperature = float(temperature)
        self.alpha = float(alpha)
        self.block_k = block_k
        self.block_b = block_b
        ks = jax.random.split(key, 8)

        def init_net(k1, k2, k3, k4):
            # bf16 weight storage (halves the dominant HBM stream); f32 biases.
            w1 = (jax.random.normal(k1, (in_features, hidden), jnp.float32) * 0.02
                  ).astype(jnp.bfloat16)
            b1 = jax.random.normal(k2, (1, hidden), jnp.float32) * 0.01
            w2 = (jax.random.normal(k3, (hidden, num_classes), jnp.float32) * 0.02
                  ).astype(jnp.bfloat16)
            b2 = jax.random.normal(k4, (1, num_classes), jnp.float32) * 0.01
            return (w1, b1, w2, b2)

        self.student = init_net(*ks[0:4])   # "network"
        self.teacher = init_net(*ks[4:8])   # "teachernet" (frozen / logits detached)

        # Pre-fused layer-1 parameters: one (F, 2H) weight / (1, 2H) bias stream so the
        # kernel drives a single MXU contraction and a single accumulator for both nets.
        w1s, b1s, w2s, b2s = self.student
        w1t, b1t, w2t, b2t = self.teacher
        self._fused = (
            jnp.concatenate([w1s, w1t], axis=1),   # (F, 2H) bf16
            jnp.concatenate([b1s, b1t], axis=1),   # (1, 2H) f32
            w2s, b2s, w2t, b2t,
        )

    def eval(self):
        self.mode = "eval"

    def train(self):
        self.mode = "train"

    def prepare_batch(self, batch):
        # cuda_tf: no-op on TPU; detach_tf in eval mode -> stop_gradient on inputs.
        if self.mode == "eval":
            batch = {k: jax.lax.stop_gradient(v) for k, v in batch.items()}
        return batch

    def forward(self, batch):
        batch = self.prepare_batch(batch)
        x = batch["data"]                     # NCHW (B, C, H, W)
        B = x.shape[0]
        xf = x.reshape(B, -1)                 # flatten NCHW row-major -> (B, C*H*W)
        labels = batch["class_id"].astype(jnp.int32).reshape(B, 1)

        # Single fused Pallas kernel: student fwd + teacher fwd (teacher is forward-only /
        # detached: no grads ever requested through it) + KD/CE/accuracy reductions.
        logits, scalars = kd_forward_fused(
            xf, self._fused, labels,
            temperature=self.temperature, block_k=self.block_k, block_b=self.block_b)

        kd = jnp.sum(scalars[:, 0]) / B       # batch-mean KL(teacher || student, T)
        ce = jnp.sum(scalars[:, 1]) / B       # batch-mean CE(student, hard label)
        acc = jnp.sum(scalars[:, 2]) / B      # top-1 accuracy
        loss = self.alpha * (self.temperature ** 2) * kd + (1.0 - self.alpha) * ce

        net_out = {"logits": logits}
        cri_out = ({"loss": loss, "loss_kd": kd, "loss_ce": ce}
                   if self.mode in ("train", "eval") else {})
        met_out = ({"accuracy_top1": acc}
                   if self.mode in ("train", "eval") else {})

        out = {}
        out.update(net_out)
        out.update(cri_out)
        out.update(met_out)
        return out


# ---------------------------------------------------------------------------
# main
# ---------------------------------------------------------------------------
if __name__ == "__main__":
    key = jax.random.PRNGKey(0)
    k_model, k_data, k_lab = jax.random.split(key, 3)

    # small NCHW batch: B=8, C=4, H=W=16  ->  in_features = 4*16*16 = 1024
    B, C_img, H_img, W_img = 8, 4, 16, 16
    hidden, num_classes = 128, 16

    x = jax.random.normal(k_data, (B, C_img, H_img, W_img), jnp.float32)
    labels = jax.random.randint(k_lab, (B,), 0, num_classes)
    batch = {"data": x, "class_id": labels}

    # block_k left as None: the whole problem fits VMEM, so the kernel runs as a
    # single grid step (no forced K tiling / no per-step pipeline overhead).
    model = KDModelPallas(k_model, in_features=C_img * H_img * W_img,
                          hidden=hidden, num_classes=num_classes,
                          temperature=4.0, alpha=0.9)

    out = model.forward(batch)
    jax.block_until_ready(out)

    # ---- reference check (pure JAX, same bf16-weight / bf16-operand recipe) ----
    xf_bf16 = x.reshape(B, -1).astype(jnp.bfloat16)

    def ref_net(params):
        w1, b1, w2, b2 = params
        h = jnp.maximum(jnp.dot(xf_bf16, w1, preferred_element_type=jnp.float32) + b1, 0.0)
        return jnp.dot(h.astype(jnp.bfloat16), w2,
                       preferred_element_type=jnp.float32) + b2

    s_ref = ref_net(model.student)
    t_ref = ref_net(model.teacher)
    assert jnp.allclose(out["logits"], s_ref, atol=1e-3, rtol=1e-3)

    T = model.temperature
    log_ps_T = jax.nn.log_softmax(s_ref / T, axis=-1)
    log_pt_T = jax.nn.log_softmax(t_ref / T, axis=-1)
    kd_ref = jnp.mean(jnp.sum(jnp.exp(log_pt_T) * (log_pt_T - log_ps_T), axis=-1))
    ce_ref = jnp.mean(-jnp.take_along_axis(
        jax.nn.log_softmax(s_ref, axis=-1), labels[:, None], axis=-1))
    loss_ref = model.alpha * T ** 2 * kd_ref + (1.0 - model.alpha) * ce_ref
    acc_ref = jnp.mean((jnp.argmax(s_ref, axis=-1) == labels).astype(jnp.float32))

    assert jnp.allclose(out["loss_kd"], kd_ref, atol=1e-3, rtol=1e-3)
    assert jnp.allclose(out["loss_ce"], ce_ref, atol=1e-3, rtol=1e-3)
    assert jnp.allclose(out["loss"], loss_ref, atol=1e-3, rtol=1e-3)
    assert jnp.allclose(out["accuracy_top1"], acc_ref, atol=1e-6)
    assert out["loss"].shape == () and out["accuracy_top1"].shape == ()

    print("KERNEL_OK")
</pallas_src>

<mosaic_0001>
module attributes {stable_mosaic.version = 11 : i64} {
  func.func @_kd_fused_kernel(%arg0: i32, %arg1: i32, %arg2: memref<8x1024xf32, #tpu.memory_space<vmem>>, %arg3: memref<1024x256xbf16, #tpu.memory_space<vmem>>, %arg4: memref<1x256xf32, #tpu.memory_space<vmem>>, %arg5: memref<128x16xbf16, #tpu.memory_space<vmem>>, %arg6: memref<1x16xf32, #tpu.memory_space<vmem>>, %arg7: memref<128x16xbf16, #tpu.memory_space<vmem>>, %arg8: memref<1x16xf32, #tpu.memory_space<vmem>>, %arg9: memref<8x1xi32, #tpu.memory_space<vmem>>, %arg10: memref<8x16xf32, #tpu.memory_space<vmem>>, %arg11: memref<1x128xf32, #tpu.memory_space<vmem>>, %arg12: memref<8x256xf32, #tpu.memory_space<vmem>>) attributes {dimension_semantics = [#tpu.dimension_semantics<parallel>, #tpu.dimension_semantics<arbitrary>], iteration_bounds = array<i64: 1, 1>, scalar_prefetch = 0 : i64, scratch_operands = 1 : i64, tpu.core_type = #tpu.core_type<tc>, window_params = [{transform_indices = @transform_0, window_bounds = array<i64: 8, 1024>}, {transform_indices = @transform_1, window_bounds = array<i64: 1024, 256>}, {pipeline_mode = #tpu.pipeline_mode<synchronous>, transform_indices = @transform_2, window_bounds = array<i64: 1, 256>}, {pipeline_mode = #tpu.pipeline_mode<synchronous>, transform_indices = @transform_3, window_bounds = array<i64: 128, 16>}, {pipeline_mode = #tpu.pipeline_mode<synchronous>, transform_indices = @transform_4, window_bounds = array<i64: 1, 16>}, {pipeline_mode = #tpu.pipeline_mode<synchronous>, transform_indices = @transform_5, window_bounds = array<i64: 128, 16>}, {pipeline_mode = #tpu.pipeline_mode<synchronous>, transform_indices = @transform_6, window_bounds = array<i64: 1, 16>}, {transform_indices = @transform_7, window_bounds = array<i64: 8, 1>}, {transform_indices = @transform_8, window_bounds = array<i64: 8, 16>}, {transform_indices = @transform_9, window_bounds = array<i64: 1, 128>}]} {
    %c0_i32 = arith.constant 0 : i32
    %0 = arith.cmpi eq, %arg1, %c0_i32 : i32
    %1 = arith.extui %0 : i1 to i32
    %c0_i32_0 = arith.constant 0 : i32
    %2 = arith.cmpi ne, %1, %c0_i32_0 : i32
    scf.if %2 {
      %cst_10 = arith.constant 0.000000e+00 : f32
      %13 = vector.broadcast %cst_10 : f32 to vector<8x256xf32>
      %c0_11 = arith.constant 0 : index
      %c0_12 = arith.constant 0 : index
      %14 = vector.load %arg12[%c0_11, %c0_12] : memref<8x256xf32, #tpu.memory_space<vmem>>, vector<8x256xf32>
      tpu.vector_store %arg12[%c0_11, %c0_12], %13 {strides = array<i32>} : memref<8x256xf32, #tpu.memory_space<vmem>>, vector<8x256xf32>,
    } else {
    }
    %c0 = arith.constant 0 : index
    %c0_1 = arith.constant 0 : index
    %3 = vector.load %arg2[%c0, %c0_1] : memref<8x1024xf32, #tpu.memory_space<vmem>>, vector<8x1024xf32>
    %4 = arith.truncf %3 : vector<8x1024xf32> to vector<8x1024xbf16>
    %c0_2 = arith.constant 0 : index
    %c0_3 = arith.constant 0 : index
    %5 = vector.load %arg12[%c0_2, %c0_3] : memref<8x256xf32, #tpu.memory_space<vmem>>, vector<8x256xf32>
    %c0_4 = arith.constant 0 : index
    %c0_5 = arith.constant 0 : index
    %6 = vector.load %arg3[%c0_4, %c0_5] : memref<1024x256xbf16, #tpu.memory_space<vmem>>, vector<1024x256xbf16>
    %cst = arith.constant dense<0.000000e+00> : vector<8x256xf32>
    %7 = tpu.matmul %4, %6, %cst {dimension_numbers = #tpu.dot_dimension_numbers<[1], [0], [0], [1], [0, 0, 1, 1], [], []>} : vector<8x1024xbf16>, vector<1024x256xbf16>, vector<8x256xf32> -> vector<8x256xf32>
    %8 = arith.addf %5, %7 : vector<8x256xf32>
    %c0_6 = arith.constant 0 : index
    %c0_7 = arith.constant 0 : index
    %9 = vector.load %arg12[%c0_6, %c0_7] : memref<8x256xf32, #tpu.memory_space<vmem>>, vector<8x256xf32>
    tpu.vector_store %arg12[%c0_6, %c0_7], %8 {strides = array<i32>} : memref<8x256xf32, #tpu.memory_space<vmem>>, vector<8x256xf32>,
    %c0_i32_8 = arith.constant 0 : i32
    %10 = arith.cmpi eq, %arg1, %c0_i32_8 : i32
    %11 = arith.extui %10 : i1 to i32
    %c0_i32_9 = arith.constant 0 : i32
    %12 = arith.cmpi ne, %11, %c0_i32_9 : i32
    scf.if %12 {
      %c0_10 = arith.constant 0 : index
      %c0_11 = arith.constant 0 : index
      %13 = vector.load %arg12[%c0_10, %c0_11] : memref<8x256xf32, #tpu.memory_space<vmem>>, vector<8x256xf32>
      %c0_12 = arith.constant 0 : index
      %c0_13 = arith.constant 0 : index
      %14 = vector.load %arg4[%c0_12, %c0_13] : memref<1x256xf32, #tpu.memory_space<vmem>>, vector<1x256xf32>
      %15 = vector.broadcast %14 : vector<1x256xf32> to vector<8x256xf32>
      %16 = arith.addf %13, %15 : vector<8x256xf32>
      %cst_14 = arith.constant 0.000000e+00 : f32
      %17 = vector.broadcast %cst_14 : f32 to vector<8x256xf32>
      %18 = arith.maximumf %16, %17 : vector<8x256xf32>
      %19 = vector.extract_strided_slice %18 {offsets = [0, 0], sizes = [8, 128], strides = [1, 1]} : vector<8x256xf32> to vector<8x128xf32>
      %20 = arith.truncf %19 : vector<8x128xf32> to vector<8x128xbf16>
      %21 = vector.extract_strided_slice %18 {offsets = [0, 128], sizes = [8, 128], strides = [1, 1]} : vector<8x256xf32> to vector<8x128xf32>
      %22 = arith.truncf %21 : vector<8x128xf32> to vector<8x128xbf16>
      %c0_15 = arith.constant 0 : index
      %c0_16 = arith.constant 0 : index
      %23 = vector.load %arg5[%c0_15, %c0_16] : memref<128x16xbf16, #tpu.memory_space<vmem>>, vector<128x16xbf16>
      %cst_17 = arith.constant dense<0.000000e+00> : vector<8x16xf32>
      %24 = tpu.matmul %20, %23, %cst_17 {dimension_numbers = #tpu.dot_dimension_numbers<[1], [0], [0], [1], [0, 0, 1, 1], [], []>} : vector<8x128xbf16>, vector<128x16xbf16>, vector<8x16xf32> -> vector<8x16xf32>
      %c0_18 = arith.constant 0 : index
      %c0_19 = arith.constant 0 : index
      %25 = vector.load %arg6[%c0_18, %c0_19] : memref<1x16xf32, #tpu.memory_space<vmem>>, vector<1x16xf32>
      %26 = vector.broadcast %25 : vector<1x16xf32> to vector<8x16xf32>
      %27 = arith.addf %24, %26 : vector<8x16xf32>
      %c0_20 = arith.constant 0 : index
      %c0_21 = arith.constant 0 : index
      %28 = vector.load %arg7[%c0_20, %c0_21] : memref<128x16xbf16, #tpu.memory_space<vmem>>, vector<128x16xbf16>
      %cst_22 = arith.constant dense<0.000000e+00> : vector<8x16xf32>
      %29 = tpu.matmul %22, %28, %cst_22 {dimension_numbers = #tpu.dot_dimension_numbers<[1], [0], [0], [1], [0, 0, 1, 1], [], []>} : vector<8x128xbf16>, vector<128x16xbf16>, vector<8x16xf32> -> vector<8x16xf32>
      %c0_23 = arith.constant 0 : index
      %c0_24 = arith.constant 0 : index
      %30 = vector.load %arg8[%c0_23, %c0_24] : memref<1x16xf32, #tpu.memory_space<vmem>>, vector<1x16xf32>
      %31 = vector.broadcast %30 : vector<1x16xf32> to vector<8x16xf32>
      %32 = arith.addf %29, %31 : vector<8x16xf32>
      %c0_25 = arith.constant 0 : index
      %c0_26 = arith.constant 0 : index
      %33 = vector.load %arg10[%c0_25, %c0_26] : memref<8x16xf32, #tpu.memory_space<vmem>>, vector<8x16xf32>
      tpu.vector_store %arg10[%c0_25, %c0_26], %27 {strides = array<i32>} : memref<8x16xf32, #tpu.memory_space<vmem>>, vector<8x16xf32>,
      %c0_27 = arith.constant 0 : index
      %c0_28 = arith.constant 0 : index
      %34 = vector.load %arg9[%c0_27, %c0_28] : memref<8x1xi32, #tpu.memory_space<vmem>>, vector<8x1xi32>
      %35 = tpu.iota {dimensions = array<i32: 1>} : vector<8x16xi32>
      %36 = vector.broadcast %34 : vector<8x1xi32> to vector<8x16xi32>
      %37 = arith.cmpi eq, %35, %36 : vector<8x16xi32>
      %38 = arith.extui %37 : vector<8x16xi1> to vector<8x16xi32>
      %39 = arith.sitofp %38 : vector<8x16xi32> to vector<8x16xf32>
      %cst_29 = arith.constant dense<0xFF800000> : vector<8xf32>
      %40 = vector.multi_reduction <maximumf>, %27, %cst_29 [1] : vector<8x16xf32> to vector<8xf32>
      %41 = vector.shape_cast %40 : vector<8xf32> to vector<8x1xf32>
      %42 = vector.broadcast %41 : vector<8x1xf32> to vector<8x16xf32>
      %43 = arith.subf %27, %42 : vector<8x16xf32>
      %44 = math.exp %43 : vector<8x16xf32>
      %cst_30 = arith.constant dense<0.000000e+00> : vector<8xf32>
      %45 = vector.multi_reduction <add>, %44, %cst_30 [1] : vector<8x16xf32> to vector<8xf32>
      %46 = vector.shape_cast %45 : vector<8xf32> to vector<8x1xf32>
      %47 = math.log %46 : vector<8x1xf32>
      %48 = arith.addf %47, %41 : vector<8x1xf32>
      %49 = vector.broadcast %48 : vector<8x1xf32> to vector<8x16xf32>
      %50 = arith.subf %27, %49 : vector<8x16xf32>
      %51 = arith.mulf %39, %50 : vector<8x16xf32>
      %52 = vector.shape_cast %51 : vector<8x16xf32> to vector<1x8x16xf32>
      %cst_31 = arith.constant dense<0.000000e+00> : vector<1xf32>
      %53 = vector.multi_reduction <add>, %52, %cst_31 [1, 2] : vector<1x8x16xf32> to vector<1xf32>
      %54 = vector.shape_cast %53 : vector<1xf32> to vector<1x1x1xf32>
      %55 = vector.extract %54[0, 0, 0] : f32 from vector<1x1x1xf32>
      %cst_32 = arith.constant 0.000000e+00 : f32
      %56 = arith.subf %cst_32, %55 : f32
      %cst_33 = arith.constant 2.500000e-01 : f32
      %57 = vector.broadcast %cst_33 : f32 to vector<8x16xf32>
      %58 = arith.mulf %27, %57 : vector<8x16xf32>
      %cst_34 = arith.constant 2.500000e-01 : f32
      %59 = vector.broadcast %cst_34 : f32 to vector<8x16xf32>
      %60 = arith.mulf %32, %59 : vector<8x16xf32>
      %cst_35 = arith.constant 2.500000e-01 : f32
      %61 = vector.broadcast %cst_35 : f32 to vector<8x1xf32>
      %62 = arith.mulf %41, %61 : vector<8x1xf32>
      %63 = vector.broadcast %62 : vector<8x1xf32> to vector<8x16xf32>
      %64 = arith.subf %58, %63 : vector<8x16xf32>
      %65 = math.exp %64 : vector<8x16xf32>
      %cst_36 = arith.constant dense<0.000000e+00> : vector<8xf32>
      %66 = vector.multi_reduction <add>, %65, %cst_36 [1] : vector<8x16xf32> to vector<8xf32>
      %67 = vector.shape_cast %66 : vector<8xf32> to vector<8x1xf32>
      %68 = math.log %67 : vector<8x1xf32>
      %69 = arith.addf %68, %62 : vector<8x1xf32>
      %70 = vector.broadcast %69 : vector<8x1xf32> to vector<8x16xf32>
      %71 = arith.subf %58, %70 : vector<8x16xf32>
      %cst_37 = arith.constant dense<0xFF800000> : vector<8xf32>
      %72 = vector.multi_reduction <maximumf>, %60, %cst_37 [1] : vector<8x16xf32> to vector<8xf32>
      %73 = vector.shape_cast %72 : vector<8xf32> to vector<8x1xf32>
      %74 = vector.broadcast %73 : vector<8x1xf32> to vector<8x16xf32>
      %75 = arith.subf %60, %74 : vector<8x16xf32>
      %76 = math.exp %75 : vector<8x16xf32>
      %cst_38 = arith.constant dense<0.000000e+00> : vector<8xf32>
      %77 = vector.multi_reduction <add>, %76, %cst_38 [1] : vector<8x16xf32> to vector<8xf32>
      %78 = vector.shape_cast %77 : vector<8xf32> to vector<8x1xf32>
      %79 = math.log %78 : vector<8x1xf32>
      %80 = arith.addf %79, %73 : vector<8x1xf32>
      %81 = vector.broadcast %80 : vector<8x1xf32> to vector<8x16xf32>
      %82 = arith.subf %60, %81 : vector<8x16xf32>
      %83 = math.exp %82 : vector<8x16xf32>
      %84 = arith.subf %82, %71 : vector<8x16xf32>
      %85 = arith.mulf %83, %84 : vector<8x16xf32>
      %86 = vector.shape_cast %85 : vector<8x16xf32> to vector<1x8x16xf32>
      %cst_39 = arith.constant dense<0.000000e+00> : vector<1xf32>
      %87 = vector.multi_reduction <add>, %86, %cst_39 [1, 2] : vector<1x8x16xf32> to vector<1xf32>
      %88 = vector.shape_cast %87 : vector<1xf32> to vector<1x1x1xf32>
      %89 = vector.extract %88[0, 0, 0] : f32 from vector<1x1x1xf32>
      %90 = vector.broadcast %41 : vector<8x1xf32> to vector<8x16xf32>
      %91 = arith.cmpf oeq, %27, %90 : vector<8x16xf32>
      %c16_i32 = arith.constant 16 : i32
      %92 = vector.broadcast %c16_i32 : i32 to vector<8x16xi32>
      %93 = arith.select %91, %35, %92 : vector<8x16xi1>, vector<8x16xi32>
      %cst_40 = arith.constant dense<2147483647> : vector<8xi32>
      %94 = vector.multi_reduction <minsi>, %93, %cst_40 [1] : vector<8x16xi32> to vector<8xi32>
      %95 = vector.shape_cast %94 : vector<8xi32> to vector<8x1xi32>
      %96 = arith.cmpi eq, %95, %34 : vector<8x1xi32>
      %97 = arith.extui %96 : vector<8x1xi1> to vector<8x1xi32>
      %98 = arith.sitofp %97 : vector<8x1xi32> to vector<8x1xf32>
      %99 = vector.shape_cast %98 : vector<8x1xf32> to vector<1x8x1xf32>
      %cst_41 = arith.constant dense<0.000000e+00> : vector<1xf32>
      %100 = vector.multi_reduction <add>, %99, %cst_41 [1, 2] : vector<1x8x1xf32> to vector<1xf32>
      %101 = vector.shape_cast %100 : vector<1xf32> to vector<1x1x1xf32>
      %102 = vector.extract %101[0, 0, 0] : f32 from vector<1x1x1xf32>
      %103 = tpu.iota {dimensions = array<i32: 1>} : vector<1x128xi32>
      %c0_i32_42 = arith.constant 0 : i32
      %104 = vector.broadcast %c0_i32_42 : i32 to vector<1x128xi32>
      %105 = arith.cmpi eq, %103, %104 : vector<1x128xi32>
      %c1_i32 = arith.constant 1 : i32
      %106 = vector.broadcast %c1_i32 : i32 to vector<1x128xi32>
      %107 = arith.cmpi eq, %103, %106 : vector<1x128xi32>
      %c2_i32 = arith.constant 2 : i32
      %108 = vector.broadcast %c2_i32 : i32 to vector<1x128xi32>
      %109 = arith.cmpi eq, %103, %108 : vector<1x128xi32>
      %cst_43 = arith.constant 0.000000e+00 : f32
      %110 = vector.broadcast %102 : f32 to vector<1x128xf32>
      %111 = vector.broadcast %cst_43 : f32 to vector<1x128xf32>
      %112 = arith.select %109, %110, %111 : vector<1x128xi1>, vector<1x128xf32>
      %113 = vector.broadcast %56 : f32 to vector<1x128xf32>
      %114 = arith.select %107, %113, %112 : vector<1x128xi1>, vector<1x128xf32>
      %115 = vector.broadcast %89 : f32 to vector<1x128xf32>
      %116 = arith.select %105, %115, %114 : vector<1x128xi1>, vector<1x128xf32>
      %c0_44 = arith.constant 0 : index
      %c0_45 = arith.constant 0 : index
      %117 = vector.load %arg11[%c0_44, %c0_45] : memref<1x128xf32, #tpu.memory_space<vmem>>, vector<1x128xf32>
      tpu.vector_store %arg11[%c0_44, %c0_45], %116 {strides = array<i32>} : memref<1x128xf32, #tpu.memory_space<vmem>>, vector<1x128xf32>,
    } else {
    }
    return
  }
  func.func @transform_0(%arg0: i32, %arg1: i32) -> (i32, i32) {
    %c0_i32 = arith.constant 0 : i32
    return %arg0, %arg1 : i32, i32
  }
  func.func @transform_1(%arg0: i32, %arg1: i32) -> (i32, i32) {
    %c0_i32 = arith.constant 0 : i32
    %c0_i32_0 = arith.constant 0 : i32
    return %arg1, %c0_i32 : i32, i32
  }
  func.func @transform_2(%arg0: i32, %arg1: i32) -> (i32, i32) {
    %c0_i32 = arith.constant 0 : i32
    %c0_i32_0 = arith.constant 0 : i32
    %c0_i32_1 = arith.constant 0 : i32
    return %c0_i32, %c0_i32_0 : i32, i32
  }
  func.func @transform_3(%arg0: i32, %arg1: i32) -> (i32, i32) {
    %c0_i32 = arith.constant 0 : i32
    %c0_i32_0 = arith.constant 0 : i32
    %c0_i32_1 = arith.constant 0 : i32
    return %c0_i32, %c0_i32_0 : i32, i32
  }
  func.func @transform_4(%arg0: i32, %arg1: i32) -> (i32, i32) {
    %c0_i32 = arith.constant 0 : i32
    %c0_i32_0 = arith.constant 0 : i32
    %c0_i32_1 = arith.constant 0 : i32
    return %c0_i32, %c0_i32_0 : i32, i32
  }
  func.func @transform_5(%arg0: i32, %arg1: i32) -> (i32, i32) {
    %c0_i32 = arith.constant 0 : i32
    %c0_i32_0 = arith.constant 0 : i32
    %c0_i32_1 = arith.constant 0 : i32
    return %c0_i32, %c0_i32_0 : i32, i32
  }
  func.func @transform_6(%arg0: i32, %arg1: i32) -> (i32, i32) {
    %c0_i32 = arith.constant 0 : i32
    %c0_i32_0 = arith.constant 0 : i32
    %c0_i32_1 = arith.constant 0 : i32
    return %c0_i32, %c0_i32_0 : i32, i32
  }
  func.func @transform_7(%arg0: i32, %arg1: i32) -> (i32, i32) {
    %c0_i32 = arith.constant 0 : i32
    %c0_i32_0 = arith.constant 0 : i32
    return %arg0, %c0_i32 : i32, i32
  }
  func.func @transform_8(%arg0: i32, %arg1: i32) -> (i32, i32) {
    %c0_i32 = arith.constant 0 : i32
    %c0_i32_0 = arith.constant 0 : i32
    return %arg0, %c0_i32 : i32, i32
  }
  func.func @transform_9(%arg0: i32, %arg1: i32) -> (i32, i32) {
    %c0_i32 = arith.constant 0 : i32
    %c0_i32_0 = arith.constant 0 : i32
    return %arg0, %c0_i32 : i32, i32
  }
}

</mosaic_0001>

<bundles_post_ra>
// kernel: tpu_custom_call.1
= control target key start
LH: loop header
LB: loop body
LE: loop exit
PB: predicated region body
PF: predicated region fallthrough
CT: control target
= control target key end

     0   :  { %15 = vsyncpa [#allocation4], 0  ;;  %s2142_s0 = inlined_call_operand.vmem [shape: f32[8,1024], index: 0, kind: input, shape index: {}]   ;;  %s2143_s1 = inlined_call_operand.hbm [shape: bf16[1024,256], index: 1, kind: input, shape index: {}]   ;;  %s2144_s2 = inlined_call_operand.vmem [shape: f32[1,256], index: 2, kind: input, shape index: {}]   ;;  %s2145_s3 = inlined_call_operand.vmem [shape: bf16[128,16], index: 3, kind: input, shape index: {}]   ;;  %s2146_s4 = inlined_call_operand.vmem [shape: f32[1,16], index: 4, kind: input, shape index: {}]   ;;  %s2147_s5 = inlined_call_operand.vmem [shape: bf16[128,16], index: 5, kind: input, shape index: {}]   ;;  %s2148_s6 = inlined_call_operand.vmem [shape: f32[1,16], index: 6, kind: input, shape index: {}]   ;;  %s2149_s7 = inlined_call_operand.vmem [shape: s32[8,1], index: 7, kind: input, shape index: {}]   ;;  %s2150_s8 = inlined_call_operand.hbm [shape: f32[8,16], index: 8, kind: output, shape index: {0}]   ;;  %s2151_s9 = inlined_call_operand.hbm [shape: f32[1,128], index: 9, kind: output, shape index: {1}]  }
   0x1   :  { %16 = vsyncpa [#allocation5], 0 }
   0x2   :  { %17 = vsyncpa [#allocation8], 0  ;;  %s1915_s30 = smov [#allocation3]   ;;  %s1843_s13 = scalar_lea.hbm %s2143_s1, 16384 }
   0x3   :  { %s25_s10 = sshll.u32 %s1915_s30, 4  ;;  %p1844_p0 = scmp.ne.s32.totalorder %s2143_s1, %s1843_s13  ;;  %s26_s10 = int_to_ptr.vmem [resolvable:$true] %s25_s10 }
   0x4   :  { %p1847_p1 = scmp.lt.u32.totalorder %s1843_s13, %s2143_s1 }
   0x6   :  { %p1849_p2 = pnand %p1847_p1, %p1844_p0 }
   0x8   :  { %1852 = shalt.err (!%p1849_p2)
}
   0x9   :  { %s1853_s18 = scalar_lea.vmem %s26_s10, 16384  ;;  %p1858_p4 = scmp.lt.s32.totalorder %s26_s10, %s26_s10 }
   0xa   :  { %p1854_p3 = scmp.ne.s32.totalorder %s26_s10, %s1853_s18  ;;  %p1859_p5 = scmp.lt.s32.totalorder %s1853_s18, %s1853_s18 }
   0xc   :  { %p1860_p6 = por %p1859_p5, %p1858_p4 }
   0xe   :  { %p1861_p7 = pnand %p1860_p6, %p1854_p3 }
  0x10   :  { %1864 = shalt.err (!%p1861_p7)
}
  0x11   :  { %s1916_s19 = smov 128   ;;  %s1917_s20 = smov 8  }
  0x12   :  { %31 = dma.hbm_to_vmem [thread:$0]  %s2143_s1, 16384, %s26_s10, [#allocation4], %s1916_s19, %s1916_s19, %s1917_s20  }
  0x13   :  { %1909 = dma.done.wait [#allocation4], 16384  }
  0x14   :  { %1910 = vsyncadd [#allocation4], 4294950912  ;;  %v1621_v0 = vld [vmem:[#allocation3 + $0x4] ss:$8 sps:$4 sm:$0xff]   ;;  %v1625_v2 = vld [vmem:[#allocation3] ss:$8 sps:$4 sm:$0xff]  }
  0x15   :  { %v1623_v1 = vld [vmem:[#allocation3 + $0x104] ss:$8 sps:$4 sm:$0xff]   ;;  %840 = vmatprep.subr.bf16.mxu0 %v1621_v0  ;;  %v1626_v3 = vld [vmem:[#allocation3 + $0x100] ss:$8 sps:$4 sm:$0xff]   ;;  %v1627_v4 = vld [vmem:[#allocation3 + $0x14] ss:$8 sps:$4 sm:$0xff]  }
  0x16   :  { %881 = vmatprep.subr.bf16.mxu1 %v1623_v1  ;;  %841 = vmatpush1.bf16.msra.mxu0 %v1625_v2  ;;  %v1629_v5 = vld [vmem:[#allocation3 + $0x114] ss:$8 sps:$4 sm:$0xff]   ;;  %v1631_v6 = vld [vmem:[#allocation3 + $0x10] ss:$8 sps:$4 sm:$0xff]   ;;  %v1633_v8 = vld [vmem:[#allocation3 + $0x24] ss:$8 sps:$4 sm:$0xff]  }
  0x17   :  { %882 = vmatpush1.bf16.msra.mxu1 %v1626_v3  ;;  %842 = vmatprep.subr.bf16.mxu0 %v1627_v4  ;;  %v1632_v7 = vld [vmem:[#allocation3 + $0x110] ss:$8 sps:$4 sm:$0xff]   ;;  %v1635_v9 = vld [vmem:[#allocation3 + $0x124] ss:$8 sps:$4 sm:$0xff]   ;;  %v1637_v10 = vld [vmem:[#allocation3 + $0x20] ss:$8 sps:$4 sm:$0xff]  }
  0x18   :  { %883 = vmatprep.subr.bf16.mxu1 %v1629_v5  ;;  %v1638_v11 = vld [vmem:[#allocation3 + $0x120] ss:$8 sps:$4 sm:$0xff]   ;;  %v1639_v12 = vld [vmem:[#allocation3 + $0x34] ss:$8 sps:$4 sm:$0xff]   ;;  %v1643_v14 = vld [vmem:[#allocation3 + $0x30] ss:$8 sps:$4 sm:$0xff]  }
  0x19   :  { %v1641_v13 = vld [vmem:[#allocation3 + $0x134] ss:$8 sps:$4 sm:$0xff]   ;;  %v1644_v15 = vld [vmem:[#allocation3 + $0x130] ss:$8 sps:$4 sm:$0xff]   ;;  %v1645_v16 = vld [vmem:[#allocation3 + $0x44] ss:$8 sps:$4 sm:$0xff]  }
  0x1a   :  { %843 = vmatpush1.bf16.msra.mxu0 %v1631_v6  ;;  %v1647_v17 = vld [vmem:[#allocation3 + $0x144] ss:$8 sps:$4 sm:$0xff]   ;;  %v1649_v18 = vld [vmem:[#allocation3 + $0x40] ss:$8 sps:$4 sm:$0xff]   ;;  %v1651_v20 = vld [vmem:[#allocation3 + $0x54] ss:$8 sps:$4 sm:$0xff]  }
  0x1b   :  { %884 = vmatpush1.bf16.msra.mxu1 %v1632_v7  ;;  %844 = vmatprep.subr.bf16.mxu0 %v1633_v8  ;;  %v1650_v19 = vld [vmem:[#allocation3 + $0x140] ss:$8 sps:$4 sm:$0xff]   ;;  %v1653_v21 = vld [vmem:[#allocation3 + $0x154] ss:$8 sps:$4 sm:$0xff]   ;;  %v1655_v22 = vld [vmem:[#allocation3 + $0x50] ss:$8 sps:$4 sm:$0xff]  }
  0x1c   :  { %885 = vmatprep.subr.bf16.mxu1 %v1635_v9  ;;  %v1656_v23 = vld [vmem:[#allocation3 + $0x150] ss:$8 sps:$4 sm:$0xff]   ;;  %v1657_v24 = vld [vmem:[#allocation3 + $0x64] ss:$8 sps:$4 sm:$0xff]   ;;  %v1661_v26 = vld [vmem:[#allocation3 + $0x60] ss:$8 sps:$4 sm:$0xff]  }
  0x1d   :  { %v1659_v25 = vld [vmem:[#allocation3 + $0x164] ss:$8 sps:$4 sm:$0xff]   ;;  %v1662_v27 = vld [vmem:[#allocation3 + $0x160] ss:$8 sps:$4 sm:$0xff]   ;;  %v1663_v28 = vld [vmem:[#allocation3 + $0x74] ss:$8 sps:$4 sm:$0xff]  }
  0x1e   :  { %845 = vmatpush1.bf16.msra.mxu0 %v1637_v10  ;;  %v1665_v29 = vld [vmem:[#allocation3 + $0x174] ss:$8 sps:$4 sm:$0xff]   ;;  %v1667_v30 = vld [vmem:[#allocation3 + $0x70] ss:$8 sps:$4 sm:$0xff]   ;;  %v1669_v32 = vld [vmem:[#allocation3 + $0x84] ss:$8 sps:$4 sm:$0xff]  }
  0x1f   :  { %886 = vmatpush1.bf16.msra.mxu1 %v1638_v11  ;;  %846 = vmatprep.subr.bf16.mxu0 %v1639_v12  ;;  %v1668_v31 = vld [vmem:[#allocation3 + $0x170] ss:$8 sps:$4 sm:$0xff]   ;;  %v1671_v33 = vld [vmem:[#allocation3 + $0x184] ss:$8 sps:$4 sm:$0xff]   ;;  %v1673_v34 = vld [vmem:[#allocation3 + $0x80] ss:$8 sps:$4 sm:$0xff]  }
  0x20   :  { %887 = vmatprep.subr.bf16.mxu1 %v1641_v13  ;;  %v1674_v35 = vld [vmem:[#allocation3 + $0x180] ss:$8 sps:$4 sm:$0xff]   ;;  %v1675_v36 = vld [vmem:[#allocation3 + $0x94] ss:$8 sps:$4 sm:$0xff]   ;;  %v1679_v38 = vld [vmem:[#allocation3 + $0x90] ss:$8 sps:$4 sm:$0xff]  }
  0x21   :  { %v1677_v37 = vld [vmem:[#allocation3 + $0x194] ss:$8 sps:$4 sm:$0xff]   ;;  %v1680_v39 = vld [vmem:[#allocation3 + $0x190] ss:$8 sps:$4 sm:$0xff]   ;;  %v1681_v40 = vld [vmem:[#allocation3 + $0xa4] ss:$8 sps:$4 sm:$0xff]  }
  0x22   :  { %847 = vmatpush1.bf16.msra.mxu0 %v1643_v14  ;;  %v1683_v41 = vld [vmem:[#allocation3 + $0x1a4] ss:$8 sps:$4 sm:$0xff]   ;;  %v1685_v42 = vld [vmem:[#allocation3 + $0xa0] ss:$8 sps:$4 sm:$0xff]   ;;  %v1687_v44 = vld [vmem:[#allocation3 + $0xb4] ss:$8 sps:$4 sm:$0xff]  }
  0x23   :  { %888 = vmatpush1.bf16.msra.mxu1 %v1644_v15  ;;  %848 = vmatprep.subr.bf16.mxu0 %v1645_v16  ;;  %v1686_v43 = vld [vmem:[#allocation3 + $0x1a0] ss:$8 sps:$4 sm:$0xff]   ;;  %v1689_v45 = vld [vmem:[#allocation3 + $0x1b4] ss:$8 sps:$4 sm:$0xff]   ;;  %v1691_v47 = vld [vmem:[#allocation3 + $0xb0] ss:$8 sps:$4 sm:$0xff]  }
  0x24   :  { %889 = vmatprep.subr.bf16.mxu1 %v1647_v17  ;;  %v55_v46 = vld [vmem:[%s2142_s0 + $0x8] sm:$0xff]  ;;  %v1692_v48 = vld [vmem:[#allocation3 + $0x1b0] ss:$8 sps:$4 sm:$0xff]   ;;  %v1699_v56 = vld [vmem:[#allocation3 + $0xd4] ss:$8 sps:$4 sm:$0xff]   ;;  %vm1919_vm0 = vmmov 0  }
  0x25   :  { %v63_v49 = vpack.c.bf16 %v55_v46, %v55_v46  ;;  %v57_v50 = vld [vmem:[%s2142_s0 + $0x18] sm:$0xff]  ;;  %v1693_v51 = vld [vmem:[#allocation3 + $0xc4] ss:$8 sps:$4 sm:$0xff]   ;;  %v1697_v54 = vld [vmem:[#allocation3 + $0xc0] ss:$8 sps:$4 sm:$0xff]   ;;  %vm1253_vm1 = vcmask 130048  }
  0x26   :  { %849 = vmatpush1.bf16.msra.mxu0 %v1649_v18  ;;  %v65_v52 = vpack.c.bf16 %v57_v50, %v57_v50  ;;  %v1695_v53 = vld [vmem:[#allocation3 + $0x1c4] ss:$8 sps:$4 sm:$0xff]   ;;  %v1698_v55 = vld [vmem:[#allocation3 + $0x1c0] ss:$8 sps:$4 sm:$0xff]   ;;  %v1701_v57 = vld [vmem:[#allocation3 + $0x1d4] ss:$8 sps:$4 sm:$0xff]  }
  0x27   :  { %890 = vmatpush1.bf16.msra.mxu1 %v1650_v19  ;;  %850 = vmatprep.subr.bf16.mxu0 %v1651_v20  ;;  %v1703_v58 = vld [vmem:[#allocation3 + $0xd0] ss:$8 sps:$4 sm:$0xff]   ;;  %v1705_v60 = vld [vmem:[#allocation3 + $0xe4] ss:$8 sps:$4 sm:$0xff]   ;;  %v1709_v62 = vld [vmem:[#allocation3 + $0xe0] ss:$8 sps:$4 sm:$0xff]  }
  0x28   :  { %891 = vmatprep.subr.bf16.mxu1 %v1653_v21  ;;  %872 = vmatprep.mubr.bf16.mxu0 %v63_v49  ;;  %v1704_v59 = vld [vmem:[#allocation3 + $0x1d0] ss:$8 sps:$4 sm:$0xff]   ;;  %v1707_v61 = vld [vmem:[#allocation3 + $0x1e4] ss:$8 sps:$4 sm:$0xff]   ;;  %v1710_v63 = vld [vmem:[#allocation3 + $0x1e0] ss:$8 sps:$4 sm:$0xff]  }
  0x29   :  { %913 = vmatprep.mubr.bf16.mxu1 %v65_v52  ;;  %v1711_v0 = vld [vmem:[#allocation3 + $0xf4] ss:$8 sps:$4 sm:$0xff]   ;;  %v1715_v2 = vld [vmem:[#allocation3 + $0xf0] ss:$8 sps:$4 sm:$0xff]   ;;  %v54_v4 = vld [vmem:[%s2142_s0] sm:$0xff]  ;;  %vm1349_vm5 = vcmask 7168  }
  0x2a   :  { %851 = vmatpush1.bf16.msra.mxu0 %v1655_v22  ;;  %v1713_v1 = vld [vmem:[#allocation3 + $0x1f4] ss:$8 sps:$4 sm:$0xff]   ;;  %v1716_v3 = vld [vmem:[#allocation3 + $0x1f0] ss:$8 sps:$4 sm:$0xff]   ;;  %v1719_v6 = vld [vmem:[#allocation3 + $0x204] ss:$8 sps:$4 sm:$0xff]   ;;  %v62_v8 = vpack.c.bf16 %v54_v4, %v54_v4 }
  0x2b   :  { %892 = vmatpush1.bf16.msra.mxu1 %v1656_v23  ;;  %852 = vmatprep.subr.bf16.mxu0 %v1657_v24  ;;  %v56_v5 = vld [vmem:[%s2142_s0 + $0x10] sm:$0xff]  ;;  %v1722_v7 = vld [vmem:[#allocation3 + $0x304] ss:$8 sps:$4 sm:$0xff]   ;;  %v1717_v10 = vld [vmem:[#allocation3 + $0x200] ss:$8 sps:$4 sm:$0xff]  }
  0x2c   :  { %893 = vmatprep.subr.bf16.mxu1 %v1659_v25  ;;  %v64_v9 = vpack.c.bf16 %v56_v5, %v56_v5  ;;  %v1720_v11 = vld [vmem:[#allocation3 + $0x300] ss:$8 sps:$4 sm:$0xff]   ;;  %v1725_v12 = vld [vmem:[#allocation3 + $0x214] ss:$8 sps:$4 sm:$0xff]   ;;  %v1723_v14 = vld [vmem:[#allocation3 + $0x210] ss:$8 sps:$4 sm:$0xff]  }
  0x2d   :  { %v1728_v13 = vld [vmem:[#allocation3 + $0x314] ss:$8 sps:$4 sm:$0xff]   ;;  %v1726_v15 = vld [vmem:[#allocation3 + $0x310] ss:$8 sps:$4 sm:$0xff]   ;;  %v1731_v16 = vld [vmem:[#allocation3 + $0x224] ss:$8 sps:$4 sm:$0xff]  }
  0x2e   :  { %853 = vmatpush1.bf16.msra.mxu0 %v1661_v26  ;;  %v1734_v17 = vld [vmem:[#allocation3 + $0x324] ss:$8 sps:$4 sm:$0xff]   ;;  %v1729_v18 = vld [vmem:[#allocation3 + $0x220] ss:$8 sps:$4 sm:$0xff]   ;;  %v1737_v20 = vld [vmem:[#allocation3 + $0x234] ss:$8 sps:$4 sm:$0xff]  }
  0x2f   :  { %894 = vmatpush1.bf16.msra.mxu1 %v1662_v27  ;;  %854 = vmatprep.subr.bf16.mxu0 %v1663_v28  ;;  %v1732_v19 = vld [vmem:[#allocation3 + $0x320] ss:$8 sps:$4 sm:$0xff]   ;;  %v1740_v21 = vld [vmem:[#allocation3 + $0x334] ss:$8 sps:$4 sm:$0xff]   ;;  %v1735_v22 = vld [vmem:[#allocation3 + $0x230] ss:$8 sps:$4 sm:$0xff]  }
  0x30   :  { %895 = vmatprep.subr.bf16.mxu1 %v1665_v29  ;;  %v1738_v23 = vld [vmem:[#allocation3 + $0x330] ss:$8 sps:$4 sm:$0xff]   ;;  %v1743_v24 = vld [vmem:[#allocation3 + $0x244] ss:$8 sps:$4 sm:$0xff]   ;;  %v1741_v26 = vld [vmem:[#allocation3 + $0x240] ss:$8 sps:$4 sm:$0xff]  }
  0x31   :  { %v1746_v25 = vld [vmem:[#allocation3 + $0x344] ss:$8 sps:$4 sm:$0xff]   ;;  %v1744_v27 = vld [vmem:[#allocation3 + $0x340] ss:$8 sps:$4 sm:$0xff]   ;;  %v1749_v28 = vld [vmem:[#allocation3 + $0x254] ss:$8 sps:$4 sm:$0xff]  }
  0x32   :  { %855 = vmatpush1.bf16.msra.mxu0 %v1667_v30  ;;  %v1752_v29 = vld [vmem:[#allocation3 + $0x354] ss:$8 sps:$4 sm:$0xff]   ;;  %v1747_v30 = vld [vmem:[#allocation3 + $0x250] ss:$8 sps:$4 sm:$0xff]   ;;  %v1765_v46 = vld [vmem:[#allocation3 + $0x280] ss:$8 sps:$4 sm:$0xff]  }
  0x33   :  { %896 = vmatpush1.bf16.msra.mxu1 %v1668_v31  ;;  %856 = vmatprep.subr.bf16.mxu0 %v1669_v32  ;;  %v1750_v31 = vld [vmem:[#allocation3 + $0x350] ss:$8 sps:$4 sm:$0xff]   ;;  %v1755_v32 = vld [vmem:[#allocation3 + $0x264] ss:$8 sps:$4 sm:$0xff]   ;;  %v1776_v49 = vld [vmem:[#allocation3 + $0x394] ss:$8 sps:$4 sm:$0xff]  }
  0x34   :  { %897 = vmatprep.subr.bf16.mxu1 %v1671_v33  ;;  %v1758_v33 = vld [vmem:[#allocation3 + $0x364] ss:$8 sps:$4 sm:$0xff]   ;;  %v1771_v50 = vld [vmem:[#allocation3 + $0x290] ss:$8 sps:$4 sm:$0xff]  }
  0x35   :  { %v1779_v52 = vld [vmem:[#allocation3 + $0x2a4] ss:$8 sps:$4 sm:$0xff]  }
  0x36   :  { %857 = vmatpush1.bf16.msra.mxu0 %v1673_v34  ;;  %v1753_v34 = vld [vmem:[#allocation3 + $0x260] ss:$8 sps:$4 sm:$0xff]   ;;  %v1803_v4 = vld [vmem:[#allocation3 + $0x2e4] ss:$8 sps:$4 sm:$0xff]  }
  0x37   :  { %898 = vmatpush1.bf16.msra.mxu1 %v1674_v35  ;;  %858 = vmatprep.subr.bf16.mxu0 %v1675_v36  ;;  %v1756_v35 = vld [vmem:[#allocation3 + $0x360] ss:$8 sps:$4 sm:$0xff]   ;;  %v1806_v5 = vld [vmem:[#allocation3 + $0x3e4] ss:$8 sps:$4 sm:$0xff]  }
  0x38   :  { %899 = vmatprep.subr.bf16.mxu1 %v1677_v37  ;;  %v59_v36 = vld [vmem:[%s2142_s0 + $0x28] sm:$0xff]  ;;  %v1761_v37 = vld [vmem:[#allocation3 + $0x274] ss:$8 sps:$4 sm:$0xff]  }
  0x3a   :  { %859 = vmatpush1.bf16.msra.mxu0 %v1679_v38  ;;  %v1764_v38 = vld [vmem:[#allocation3 + $0x374] ss:$8 sps:$4 sm:$0xff]  }
  0x3b   :  { %900 = vmatpush1.bf16.msra.mxu1 %v1680_v39  ;;  %860 = vmatprep.subr.bf16.mxu0 %v1681_v40  ;;  %v67_v39 = vpack.c.bf16 %v59_v36, %v59_v36  ;;  %v61_v40 = vld [vmem:[%s2142_s0 + $0x38] sm:$0xff] }
  0x3c   :  { %901 = vmatprep.subr.bf16.mxu1 %v1683_v41  ;;  %v69_v41 = vpack.c.bf16 %v61_v40, %v61_v40 }
  0x3e   :  { %861 = vmatpush1.bf16.msra.mxu0 %v1685_v42  ;;  %v1759_v42 = vld [vmem:[#allocation3 + $0x270] ss:$8 sps:$4 sm:$0xff]  }
  0x3f   :  { %902 = vmatpush1.bf16.msra.mxu1 %v1686_v43  ;;  %862 = vmatprep.subr.bf16.mxu0 %v1687_v44  ;;  %v1762_v43 = vld [vmem:[#allocation3 + $0x370] ss:$8 sps:$4 sm:$0xff]   ;;  %v1767_v44 = vld [vmem:[#allocation3 + $0x284] ss:$8 sps:$4 sm:$0xff]  }
  0x40   :  { %903 = vmatprep.subr.bf16.mxu1 %v1689_v45  ;;  %v1770_v45 = vld [vmem:[#allocation3 + $0x384] ss:$8 sps:$4 sm:$0xff]  }
  0x42   :  { %863 = vmatpush1.bf16.msra.mxu0 %v1691_v47  ;;  %v1768_v47 = vld [vmem:[#allocation3 + $0x380] ss:$8 sps:$4 sm:$0xff]  }
  0x43   :  { %904 = vmatpush1.bf16.msra.mxu1 %v1692_v48  ;;  %864 = vmatprep.subr.bf16.mxu0 %v1693_v51  ;;  %v1773_v48 = vld [vmem:[#allocation3 + $0x294] ss:$8 sps:$4 sm:$0xff]   ;;  %v1774_v51 = vld [vmem:[#allocation3 + $0x390] ss:$8 sps:$4 sm:$0xff]  }
  0x44   :  { %905 = vmatprep.subr.bf16.mxu1 %v1695_v53  ;;  %v1782_v53 = vld [vmem:[#allocation3 + $0x3a4] ss:$8 sps:$4 sm:$0xff]  }
  0x46   :  { %865 = vmatpush1.bf16.msra.mxu0 %v1697_v54  ;;  %v1777_v54 = vld [vmem:[#allocation3 + $0x2a0] ss:$8 sps:$4 sm:$0xff]  }
  0x47   :  { %906 = vmatpush1.bf16.msra.mxu1 %v1698_v55  ;;  %866 = vmatprep.subr.bf16.mxu0 %v1699_v56  ;;  %v1780_v55 = vld [vmem:[#allocation3 + $0x3a0] ss:$8 sps:$4 sm:$0xff]   ;;  %v1785_v56 = vld [vmem:[#allocation3 + $0x2b4] ss:$8 sps:$4 sm:$0xff]  }
  0x48   :  { %907 = vmatprep.subr.bf16.mxu1 %v1701_v57  ;;  %v1788_v57 = vld [vmem:[#allocation3 + $0x3b4] ss:$8 sps:$4 sm:$0xff]  }
  0x4a   :  { %867 = vmatpush1.bf16.msra.mxu0 %v1703_v58  ;;  %v1783_v58 = vld [vmem:[#allocation3 + $0x2b0] ss:$8 sps:$4 sm:$0xff]  }
  0x4b   :  { %908 = vmatpush1.bf16.msra.mxu1 %v1704_v59  ;;  %868 = vmatprep.subr.bf16.mxu0 %v1705_v60  ;;  %v1786_v59 = vld [vmem:[#allocation3 + $0x3b0] ss:$8 sps:$4 sm:$0xff]   ;;  %v1791_v60 = vld [vmem:[#allocation3 + $0x2c4] ss:$8 sps:$4 sm:$0xff]  }
  0x4c   :  { %909 = vmatprep.subr.bf16.mxu1 %v1707_v61  ;;  %v1794_v61 = vld [vmem:[#allocation3 + $0x3c4] ss:$8 sps:$4 sm:$0xff]  }
  0x4e   :  { %869 = vmatpush1.bf16.msra.mxu0 %v1709_v62  ;;  %v1789_v62 = vld [vmem:[#allocation3 + $0x2c0] ss:$8 sps:$4 sm:$0xff]  }
  0x4f   :  { %910 = vmatpush1.bf16.msra.mxu1 %v1710_v63  ;;  %870 = vmatprep.subr.bf16.mxu0 %v1711_v0  ;;  %v1792_v63 = vld [vmem:[#allocation3 + $0x3c0] ss:$8 sps:$4 sm:$0xff]   ;;  %v1797_v0 = vld [vmem:[#allocation3 + $0x2d4] ss:$8 sps:$4 sm:$0xff]  }
  0x50   :  { %911 = vmatprep.subr.bf16.mxu1 %v1713_v1  ;;  %v1800_v1 = vld [vmem:[#allocation3 + $0x3d4] ss:$8 sps:$4 sm:$0xff]  }
  0x52   :  { %871 = vmatpush1.bf16.msra.mxu0 %v1715_v2  ;;  %v1795_v2 = vld [vmem:[#allocation3 + $0x2d0] ss:$8 sps:$4 sm:$0xff]  }
  0x53   :  { %912 = vmatpush1.bf16.msra.mxu1 %v1716_v3  ;;  %922 = vmatprep.subr.bf16.mxu0 %v1719_v6  ;;  %v1798_v3 = vld [vmem:[#allocation3 + $0x3d0] ss:$8 sps:$4 sm:$0xff]   ;;  %v1801_v6 = vld [vmem:[#allocation3 + $0x2e0] ss:$8 sps:$4 sm:$0xff]  }
  0x54   :  { %963 = vmatprep.subr.bf16.mxu1 %v1722_v7  ;;  %v1804_v7 = vld [vmem:[#allocation3 + $0x3e0] ss:$8 sps:$4 sm:$0xff]  }
  0x55   :  { %873 = vmatmul.mubr.bf16.vlgmr.msra.gmra.mrb[0].mxu0 %v62_v8  ;;  %v1809_v8 = vld [vmem:[#allocation3 + $0x2f4] ss:$8 sps:$4 sm:$0xff]  }
  0x56   :  { %914 = vmatmul.mubr.bf16.vlgmr.msra.gmra.mrb[0].mxu1 %v64_v9  ;;  %923 = vmatpush1.bf16.msra.mxu0 %v1717_v10  ;;  %v1812_v9 = vld [vmem:[#allocation3 + $0x3f4] ss:$8 sps:$4 sm:$0xff]   ;;  %v1807_v10 = vld [vmem:[#allocation3 + $0x2f0] ss:$8 sps:$4 sm:$0xff]  }
  0x57   :  { %964 = vmatpush1.bf16.msra.mxu1 %v1720_v11  ;;  %924 = vmatprep.subr.bf16.mxu0 %v1725_v12  ;;  %v1810_v11 = vld [vmem:[#allocation3 + $0x3f0] ss:$8 sps:$4 sm:$0xff]   ;;  %v58_v12 = vld [vmem:[%s2142_s0 + $0x20] sm:$0xff] }
  0x58   :  { %965 = vmatprep.subr.bf16.mxu1 %v1728_v13  ;;  %954 = vmatprep.mubr.bf16.mxu0 %v67_v39  ;;  %v60_v13 = vld [vmem:[%s2142_s0 + $0x30] sm:$0xff] }
  0x59   :  { %995 = vmatprep.mubr.bf16.mxu1 %v69_v41 }
  0x5a   :  { %925 = vmatpush1.bf16.msra.mxu0 %v1723_v14  ;;  %v66_v14 = vpack.c.bf16 %v58_v12, %v58_v12 }
  0x5b   :  { %966 = vmatpush1.bf16.msra.mxu1 %v1726_v15  ;;  %926 = vmatprep.subr.bf16.mxu0 %v1731_v16  ;;  %v68_v15 = vpack.c.bf16 %v60_v13, %v60_v13  ;;  %v1813_v16 = vld [vmem:[%s2145_s3] sm:$0xff]  }
  0x5c   :  { %967 = vmatprep.subr.bf16.mxu1 %v1734_v17  ;;  %v1814_v17 = vld [vmem:[%s2147_s5] sm:$0xff]  }
  0x5e   :  { %927 = vmatpush1.bf16.msra.mxu0 %v1729_v18  ;;  %v1918_v18 = vmov 0.0  }
  0x5f   :  { %968 = vmatpush1.bf16.msra.mxu1 %v1732_v19  ;;  %928 = vmatprep.subr.bf16.mxu0 %v1737_v20  ;;  %v1815_v19 = vld [vmem:[%s2145_s3 + $0x8] sm:$0xff]  }
  0x60   :  { %969 = vmatprep.subr.bf16.mxu1 %v1740_v21  ;;  %v1816_v20 = vld [vmem:[%s2147_s5 + $0x8] sm:$0xff]   ;;  %v1817_v21 = vld [vmem:[%s2145_s3 + $0x10] sm:$0xff]  }
  0x62   :  { %929 = vmatpush1.bf16.msra.mxu0 %v1735_v22  ;;  %v1818_v22 = vld [vmem:[%s2147_s5 + $0x10] sm:$0xff]  }
  0x63   :  { %970 = vmatpush1.bf16.msra.mxu1 %v1738_v23  ;;  %930 = vmatprep.subr.bf16.mxu0 %v1743_v24  ;;  %v1819_v23 = vld [vmem:[%s2145_s3 + $0x18] sm:$0xff]  }
  0x64   :  { %971 = vmatprep.subr.bf16.mxu1 %v1746_v25  ;;  %v1820_v24 = vld [vmem:[%s2147_s5 + $0x18] sm:$0xff]   ;;  %v1821_v25 = vld [vmem:[%s2145_s3 + $0x20] sm:$0xff]  }
  0x66   :  { %931 = vmatpush1.bf16.msra.mxu0 %v1741_v26  ;;  %v1822_v26 = vld [vmem:[%s2147_s5 + $0x20] sm:$0xff]  }
  0x67   :  { %972 = vmatpush1.bf16.msra.mxu1 %v1744_v27  ;;  %932 = vmatprep.subr.bf16.mxu0 %v1749_v28  ;;  %v1823_v27 = vld [vmem:[%s2145_s3 + $0x28] sm:$0xff]  }
  0x68   :  { %973 = vmatprep.subr.bf16.mxu1 %v1752_v29  ;;  %v1824_v28 = vld [vmem:[%s2147_s5 + $0x28] sm:$0xff]   ;;  %v1825_v29 = vld [vmem:[%s2145_s3 + $0x30] sm:$0xff]  }
  0x6a   :  { %933 = vmatpush1.bf16.msra.mxu0 %v1747_v30  ;;  %v1826_v30 = vld [vmem:[%s2147_s5 + $0x30] sm:$0xff]  }
  0x6b   :  { %974 = vmatpush1.bf16.msra.mxu1 %v1750_v31  ;;  %934 = vmatprep.subr.bf16.mxu0 %v1755_v32  ;;  %v1827_v31 = vld [vmem:[%s2145_s3 + $0x38] sm:$0xff]  }
  0x6c   :  { %975 = vmatprep.subr.bf16.mxu1 %v1758_v33  ;;  %v1828_v32 = vld [vmem:[%s2147_s5 + $0x38] sm:$0xff]  }
  0x6e   :  { %935 = vmatpush1.bf16.msra.mxu0 %v1753_v34 }
  0x6f   :  { %976 = vmatpush1.bf16.msra.mxu1 %v1756_v35  ;;  %936 = vmatprep.subr.bf16.mxu0 %v1761_v37 }
  0x70   :  { %977 = vmatprep.subr.bf16.mxu1 %v1764_v38 }
  0x72   :  { %937 = vmatpush1.bf16.msra.mxu0 %v1759_v42 }
  0x73   :  { %978 = vmatpush1.bf16.msra.mxu1 %v1762_v43  ;;  %938 = vmatprep.subr.bf16.mxu0 %v1767_v44  ;;  %v1015_v43 = vlaneseq }
  0x74   :  { %979 = vmatprep.subr.bf16.mxu1 %v1770_v45 }
  0x75   :  { %v1016_v44 = vshrl.u32 %v1015_v43, 7 }
  0x76   :  { %939 = vmatpush1.bf16.msra.mxu0 %v1765_v46  ;;  %v1013_v46 = vld [vmem:[%s2144_s2] sm:$0x3] }
  0x77   :  { %980 = vmatpush1.bf16.msra.mxu1 %v1768_v47  ;;  %940 = vmatprep.subr.bf16.mxu0 %v1773_v48  ;;  %v1017_v45 = vsub.s32 0, %v1016_v44  ;;  %v1021_v47 = vsub.s32 1, %v1016_v44 }
  0x78   :  { %981 = vmatprep.subr.bf16.mxu1 %v1776_v49 }
  0x7a   :  { %941 = vmatpush1.bf16.msra.mxu0 %v1771_v50 }
  0x7b   :  { %982 = vmatpush1.bf16.msra.mxu1 %v1774_v51  ;;  %942 = vmatprep.subr.bf16.mxu0 %v1779_v52  ;;  %v1018_v51 = vrot.slane %v1013_v46, %v1017_v45 }
  0x7c   :  { %983 = vmatprep.subr.bf16.mxu1 %v1782_v53 }
  0x7e   :  { %943 = vmatpush1.bf16.msra.mxu0 %v1777_v54 }
  0x7f   :  { %984 = vmatpush1.bf16.msra.mxu1 %v1780_v55  ;;  %944 = vmatprep.subr.bf16.mxu0 %v1785_v56  ;;  %v1022_v55 = vrot.slane %v1013_v46, %v1021_v47 }
  0x80   :  { %985 = vmatprep.subr.bf16.mxu1 %v1788_v57 }
  0x82   :  { %945 = vmatpush1.bf16.msra.mxu0 %v1783_v58 }
  0x83   :  { %986 = vmatpush1.bf16.msra.mxu1 %v1786_v59  ;;  %946 = vmatprep.subr.bf16.mxu0 %v1791_v60 }
  0x84   :  { %987 = vmatprep.subr.bf16.mxu1 %v1794_v61 }
  0x86   :  { %947 = vmatpush1.bf16.msra.mxu0 %v1789_v62 }
  0x87   :  { %988 = vmatpush1.bf16.msra.mxu1 %v1792_v63  ;;  %948 = vmatprep.subr.bf16.mxu0 %v1797_v0 }
  0x88   :  { %989 = vmatprep.subr.bf16.mxu1 %v1800_v1 }
  0x8a   :  { %949 = vmatpush1.bf16.msra.mxu0 %v1795_v2 }
  0x8b   :  { %990 = vmatpush1.bf16.msra.mxu1 %v1798_v3  ;;  %950 = vmatprep.subr.bf16.mxu0 %v1803_v4  ;;  %v1527_v4 = vld [vmem:[%s2146_s4] ss:$0 sm:$0xff] }
  0x8c   :  { %991 = vmatprep.subr.bf16.mxu1 %v1806_v5  ;;  %v1536_v5 = vld [vmem:[%s2148_s6] ss:$0 sm:$0xff] }
  0x8e   :  { %951 = vmatpush1.bf16.msra.mxu0 %v1801_v6 }
  0x8f   :  { %992 = vmatpush1.bf16.msra.mxu1 %v1804_v7  ;;  %952 = vmatprep.subr.bf16.mxu0 %v1809_v8 }
  0x90   :  { %993 = vmatprep.subr.bf16.mxu1 %v1812_v9 }
  0x92   :  { %953 = vmatpush1.bf16.msra.mxu0 %v1807_v10 }
  0x93   :  { %994 = vmatpush1.bf16.msra.mxu1 %v1810_v11  ;;  %1565 = vmatprep.subr.bf16.mxu0 %v1918_v18 }
  0x94   :  { %1585 = vmatprep.subr.bf16.mxu1 %v1918_v18 }
  0x95   :  { %955 = vmatmul.mubr.bf16.vlgmr.msra.gmra.mrb[4].mxu0 %v66_v14 }
  0x96   :  { %996 = vmatmul.mubr.bf16.vlgmr.msra.gmra.mrb[4].mxu1 %v68_v15  ;;  %1566 = vmatpush3.bf16.msra.mxu0 %v1813_v16 }
  0x97   :  { %1586 = vmatpush3.bf16.msra.mxu1 %v1814_v17  ;;  %1567 = vmatprep.subr.bf16.mxu0 %v1918_v18 }
  0x98   :  { %1587 = vmatprep.subr.bf16.mxu1 %v1918_v18  ;;  %1581 = vmatprep.mubr.msk.bf16.mxu0 %vm1919_vm0, %v1918_v18 }
  0x99   :  { %1601 = vmatprep.mubr.msk.bf16.mxu1 %vm1919_vm0, %v1918_v18 }
  0x9a   :  { %1568 = vmatpush3.bf16.msra.mxu0 %v1815_v19 }
  0x9b   :  { %1588 = vmatpush3.bf16.msra.mxu1 %v1816_v20  ;;  %1569 = vmatprep.subr.bf16.mxu0 %v1918_v18  ;;  %v1920_v20 = vmov 0  }
  0x9c   :  { %1589 = vmatprep.subr.bf16.mxu1 %v1918_v18  ;;  %1619 = vset.pattern.permute.xlu1 %v1920_v20 }
  0x9d   :  { %1620 = vset.pattern.permute.xlu0 %v1920_v20 }
  0x9e   :  { %1570 = vmatpush3.bf16.msra.mxu0 %v1817_v21  ;;  %v2094_v21 = vand.u32 127, %v1015_v43 }
  0x9f   :  { %1590 = vmatpush3.bf16.msra.mxu1 %v1818_v22  ;;  %1571 = vmatprep.subr.bf16.mxu0 %v1918_v18 }
  0xa0   :  { %1591 = vmatprep.subr.bf16.mxu1 %v1918_v18 }
  0xa2   :  { %1572 = vmatpush3.bf16.msra.mxu0 %v1819_v23 }
  0xa3   :  { %1592 = vmatpush3.bf16.msra.mxu1 %v1820_v24  ;;  %1573 = vmatprep.subr.bf16.mxu0 %v1918_v18 }
  0xa4   :  { %1593 = vmatprep.subr.bf16.mxu1 %v1918_v18 }
  0xa6   :  { %1574 = vmatpush3.bf16.msra.mxu0 %v1821_v25 }
  0xa7   :  { %1594 = vmatpush3.bf16.msra.mxu1 %v1822_v26  ;;  %1575 = vmatprep.subr.bf16.mxu0 %v1918_v18 }
  0xa8   :  { %1595 = vmatprep.subr.bf16.mxu1 %v1918_v18 }
  0xaa   :  { %1576 = vmatpush3.bf16.msra.mxu0 %v1823_v27 }
  0xab   :  { %1596 = vmatpush3.bf16.msra.mxu1 %v1824_v28  ;;  %1577 = vmatprep.subr.bf16.mxu0 %v1918_v18 }
  0xac   :  { %1597 = vmatprep.subr.bf16.mxu1 %v1918_v18 }
  0xae   :  { %1578 = vmatpush3.bf16.msra.mxu0 %v1825_v29 }
  0xaf   :  { %1598 = vmatpush3.bf16.msra.mxu1 %v1826_v30  ;;  %1579 = vmatprep.subr.bf16.mxu0 %v1918_v18 }
  0xb0   :  { %1599 = vmatprep.subr.bf16.mxu1 %v1918_v18 }
  0xb2   :  { %1580 = vmatpush3.bf16.msra.mxu0 %v1827_v31 }
  0xb3   :  { %1600 = vmatpush3.bf16.msra.mxu1 %v1828_v32 }
 0x128   :  { %v874_v33 = vpop.f32.mrb[0].mxu0 }
 0x129   :  { %v915_v34 = vpop.f32.mrb[0].mxu1  ;;  %v876_v36 = vpop.f32.mrb[1].mxu0 }
 0x12a   :  { %v916_v35 = vadd.f32 %v915_v34, %v874_v33  ;;  %v917_v37 = vpop.f32.mrb[1].mxu1  ;;  %v878_v39 = vpop.f32.mrb[2].mxu0 }
 0x12b   :  { %v918_v38 = vadd.f32 %v917_v37, %v876_v36  ;;  %v919_v40 = vpop.f32.mrb[2].mxu1  ;;  %v879_v41 = vpop.f32.mrb[3].mxu0 }
 0x12c   :  { %v920_v42 = vpop.f32.mrb[3].mxu1 }
 0x12d   :  { %v1255_v42 = vld [vmem:[%s2149_s7] sm:$0xff]  ;;  %s1921_s7 = smov [#allocation6]  }
 0x12e   :  { %s1376_s27 = sshll.u32 %s1921_s7, 4  ;;  %s1377_s27 = int_to_ptr.vmem [resolvable:$true] %s1376_s27 }
 0x12f   :  { %s1865_s28 = scalar_lea.vmem %s1377_s27, 128  ;;  %p1870_p9 = scmp.lt.s32.totalorder %s1377_s27, %s1377_s27 }
 0x130   :  { %p1866_p8 = scmp.ne.s32.totalorder %s1377_s27, %s1865_s28  ;;  %p1871_p10 = scmp.lt.s32.totalorder %s1865_s28, %s1865_s28 }
 0x132   :  { %p1872_p11 = por %p1871_p10, %p1870_p9 }
 0x134   :  { %p1873_p12 = pnand %p1872_p11, %p1866_p8 }
 0x168   :  { %v956_v48 = vpop.f32.mrb[4].mxu0 }
 0x169   :  { %v997_v49 = vpop.f32.mrb[4].mxu1  ;;  %v957_v50 = vadd.f32 %v956_v48, %v916_v35  ;;  %v958_v52 = vpop.f32.mrb[5].mxu0 }
 0x16a   :  { %v999_v53 = vpop.f32.mrb[5].mxu1  ;;  %v959_v54 = vadd.f32 %v958_v52, %v918_v38  ;;  %v960_v56 = vpop.f32.mrb[6].mxu0 }
 0x16b   :  { %v1001_v57 = vpop.f32.mrb[6].mxu1  ;;  %v998_v58 = vadd.f32 %v997_v49, %v957_v50  ;;  %v961_v59 = vpop.f32.mrb[7].mxu0 }
 0x16c   :  { %v1002_v60 = vpop.f32.mrb[7].mxu1  ;;  %v1000_v61 = vadd.f32 %v999_v53, %v959_v54 }
 0x16d   :  { %v1025_v62 = vadd.f32 %v1018_v51, %v998_v58 }
 0x16e   :  { %v1026_v63 = vadd.f32 %v1022_v55, %v1000_v61 }
 0x16f   :  { %v1027_v0 = vmax.f32 %v1025_v62, 0.0 }
 0x170   :  { %v1028_v1 = vmax.f32 %v1026_v63, 0.0 }
 0x171   :  { %v1029_v2 = vpack.c.bf16 %v1027_v0, %v1027_v0 }
 0x172   :  { %v1030_v3 = vpack.c.bf16 %v1028_v1, %v1028_v1 }
 0x173   :  { %1582 = vmatmul.mubr.bf16.vlgmr.msra.gmra.mrb[8].mxu0 %v1029_v2 }
 0x174   :  { %1602 = vmatmul.mubr.bf16.vlgmr.msra.gmra.mrb[8].mxu1 %v1030_v3 }
 0x246   :  { %v1136_v6 = vpop.f32.mrb[8].mxu0 }
 0x247   :  { %v2084_v7 = vadd.f32 %v1527_v4, %v1136_v6  ;;  %v1583_v8 = vpop.f32.mrb[9].mxu0  ;;  %v1247_v9 = vpop.f32.mrb[8].mxu1 }
 0x248   :  { %v1248_v10 = vadd.f32 %v1536_v5, %v1247_v9  ;;  %v1139_v11 = vpop.f32.mrb[10].mxu0  ;;  %v1603_v12 = vpop.f32.mrb[9].mxu1 }
 0x249   :  { %v1584_v13 = vpop.f32.mrb[11].mxu0  ;;  %v1250_v14 = vpop.f32.mrb[10].mxu1  ;;  %v1264_v15 = vsel %vm1253_vm1, %v2084_v7, -inf  ;;  %1254 = vst.msk [vmem:[#allocation6] sm:$0xff] %vm1253_vm1, %v2084_v7  ;;  %v1289_v23 = vmul.f32 0.25, %v2084_v7 }
 0x24a   :  { %v2090_v16 = vmul.f32 0.25, %v1248_v10  ;;  %v1604_v17 = vpop.f32.mrb[11].mxu1  ;;  %1265 = vmax.xlane.f32.xlu0 %v1264_v15 }
 0x24c   :  { %v1302_v19 = vsel %vm1253_vm1, %v2090_v16, -inf }
 0x24e   :  { %1303 = vmax.xlane.f32.xlu0 %v1302_v19 }
 0x2d7   :  { %v1266_v22 = vpop.xlane.xlu0 %1265 }
 0x2d8   :  { %v1267_v24 = vsub.f32 %v2084_v7, %v1266_v22  ;;  %v1291_v25 = vmul.f32 0.25, %v1266_v22  ;;  %vm1329_vm2 = vcmp.eq.f32.partialorder %v2084_v7, %v1266_v22 }
 0x2d9   :  { %v1330_v26 = vsel %vm1329_vm2, %v2094_v21, 16 }
 0x2da   :  { %v1268_v27 = vmul.f32 1.442695, %v1267_v24  ;;  %v1292_v28 = vsub.f32 %v1289_v23, %v1291_v25  ;;  %v1331_v29 = vsel %vm1253_vm1, %v1330_v26, 2147483647 }
 0x2db   :  { %v1304_v30 = vpop.xlane.xlu0 %1303  ;;  %v1333_v31 = vshra.s32 %v1331_v29, 16  ;;  %v1332_v43 = vand.u32 65535, %v1331_v29 }
 0x2dc   :  { %1829 = vpow2.f32 %v1268_v27  ;;  %v1293_v32 = vmul.f32 1.442695, %v1292_v28  ;;  %v1305_v33 = vsub.f32 %v2090_v16, %v1304_v30 }
 0x2dd   :  { %v1335_v34 = vcvt.s32.f32 %v1333_v31  ;;  %v1334_v45 = vcvt.s32.f32 %v1332_v43 }
 0x2de   :  { %1831 = vpow2.f32 %v1293_v32  ;;  %v1306_v35 = vmul.f32 1.442695, %v1305_v33 }
 0x2df   :  { %1336 = vmin.xlane.f32.xlu1 %v1335_v34 }
 0x2e0   :  { %1833 = vpow2.f32 %v1306_v35 }
 0x2e6   :  { %v1830_v36 = vpop.eup %1829 }
 0x2e7   :  { %v1270_v37 = vsel %vm1253_vm1, %v1830_v36, 0.0 }
 0x2e8   :  { %v1832_v38 = vpop.eup %1831  ;;  %1271 = vadd.xlane.f32.xlu1 %v1270_v37 }
 0x2e9   :  { %v1295_v39 = vsel %vm1253_vm1, %v1832_v38, 0.0 }
 0x2ea   :  { %v1834_v40 = vpop.eup %1833  ;;  %1296 = vadd.xlane.f32.xlu0 %v1295_v39 }
 0x2eb   :  { %v1308_v41 = vsel %vm1253_vm1, %v1834_v40, 0.0 }
 0x2ec   :  { %1309 = vadd.xlane.f32.xlu1 %v1308_v41 }
 0x2fd   :  { %1259 = vperm.xlu1 %1619, %v1255_v42  }
 0x36c   :  { %v1337_v44 = vpop.xlane.xlu1 %1336 }
 0x36d   :  { %vm1338_vm3 = vcmp.eq.f32.partialorder %v1335_v34, %v1337_v44 }
 0x36e   :  { %v1339_v46 = vsel %vm1338_vm3, %v1334_v45, inf }
 0x36f   :  { %1340 = vmin.xlane.f32.xlu0 %v1339_v46 }
 0x375   :  { %v1272_v47 = vpop.xlane.xlu1 %1271 }
 0x376   :  { %1835 = vlog2.f32 %v1272_v47 }
 0x377   :  { %v1297_v49 = vpop.xlane.xlu0 %1296 }
 0x379   :  { %v1310_v48 = vpop.xlane.xlu1 %1309 }
 0x37a   :  { %1837 = vlog2.f32 %v1310_v48 }
 0x37b   :  { %1839 = vlog2.f32 %v1297_v49 }
 0x37d   :  { %v1260_v50 = vpop.permute.xlu1 %1259 }
 0x37e   :  { %vm1261_vm4 = vcmp.eq.s32.totalorder %v2094_v21, %v1260_v50 }
 0x37f   :  { %v1545_v55 = vsel %vm1261_vm4, 1.0, %v1918_v18 }
 0x380   :  { %v1836_v51 = vpop.eup %1835 }
 0x381   :  { %v1274_v52 = vmul.f32 0.6931472, %v1836_v51 }
 0x383   :  { %v1275_v53 = vadd.f32 %v1274_v52, %v1266_v22 }
 0x384   :  { %v1838_v54 = vpop.eup %1837 }
 0x385   :  { %v1312_v56 = vmul.f32 0.6931472, %v1838_v54  ;;  %v1276_v57 = vsub.f32 %v2084_v7, %v1275_v53  ;;  %v1840_v60 = vpop.eup %1839  ;;  %v1343_v7 = vcvt.f32.s32 %v1337_v44 }
 0x386   :  { %v1299_v0 = vmul.f32 0.6931472, %v1840_v60 }
 0x387   :  { %v1313_v58 = vadd.f32 %v1312_v56, %v1304_v30  ;;  %v1277_v59 = vmul.f32 %v1545_v55, %v1276_v57  ;;  %v1344_v9 = vshll.u32 %v1343_v7, 16 }
 0x388   :  { %v1300_v1 = vadd.f32 %v1299_v0, %v1291_v25 }
 0x389   :  { %v1278_v61 = vsel %vm1253_vm1, %v1277_v59, 0.0  ;;  %v1314_v62 = vsub.f32 %v2090_v16, %v1313_v58 }
 0x38a   :  { %1279 = vadd.xlane.f32.xlu0 %v1278_v61  ;;  %v1301_v2 = vsub.f32 %v1289_v23, %v1300_v1 }
 0x38b   :  { %v1315_v63 = vmul.f32 1.442695, %v1314_v62 }
 0x38c   :  { %v1317_v3 = vsub.f32 %v1314_v62, %v1301_v2 }
 0x38d   :  { %1841 = vpow2.f32 %v1315_v63 }
 0x397   :  { %v1842_v4 = vpop.eup %1841 }
 0x398   :  { %v1318_v5 = vmul.f32 %v1842_v4, %v1317_v3 }
 0x39a   :  { %v1319_v6 = vsel %vm1253_vm1, %v1318_v5, 0.0 }
 0x39b   :  { %1320 = vadd.xlane.f32.xlu0 %v1319_v6 }
 0x3fc   :  { %v1341_v8 = vpop.xlane.xlu0 %1340 }
 0x3fd   :  { %v1342_v10 = vcvt.f32.s32 %v1341_v8 }
 0x3ff   :  { %v1345_v11 = vadd.s32 %v1344_v9, %v1342_v10 }
 0x401   :  { %vm1346_vm6 = vcmp.eq.s32.totalorder %v1345_v11, %v1255_v42 }
 0x402   :  { %v1546_v12 = vsel %vm1346_vm6, 1.0, %v1918_v18 }
 0x403   :  { %v1350_v13 = vsel %vm1349_vm5, %v1546_v12, 0.0 }
 0x404   :  { %1351 = vadd.xlane.f32.xlu0 %v1350_v13 }
 0x417   :  { %v1280_v14 = vpop.xlane.xlu0 %1279 }
 0x418   :  { %v1281_v15 = vrot.slane %v1280_v14, 4 }
 0x41a   :  { %v1282_v16 = vadd.f32 %v1281_v15, %v1280_v14 }
 0x41c   :  { %v1283_v17 = vrot.slane %v1282_v16, 2 }
 0x41e   :  { %v1284_v19 = vadd.f32 %v1283_v17, %v1282_v16 }
 0x420   :  { %v1285_v20 = vrot.slane %v1284_v19, 1 }
 0x422   :  { %v1286_v22 = vadd.f32 %v1285_v20, %v1284_v19 }
 0x424   :  { %1605 = vpush %v1286_v22 }
 0x428   :  { %v1321_v23 = vpop.xlane.xlu0 %1320 }
 0x429   :  { %v1322_v24 = vrot.slane %v1321_v23, 4 }
 0x42b   :  { %v1323_v25 = vadd.f32 %v1322_v24, %v1321_v23 }
 0x42d   :  { %v1324_v26 = vrot.slane %v1323_v25, 2 }
 0x42f   :  { %v1325_v27 = vadd.f32 %v1324_v26, %v1323_v25 }
 0x431   :  { %v1326_v28 = vrot.slane %v1325_v27, 1 }
 0x433   :  { %v1327_v29 = vadd.f32 %v1326_v28, %v1325_v27 }
 0x435   :  { %1607 = vpush %v1327_v29 }
 0x436   :  { %1876 = shalt.err (!%p1873_p12)
}
 0x437   :  { %s1877_s10 = scalar_lea.hbm %s2150_s8, 128 }
 0x438   :  { %p1878_p13 = scmp.ne.s32.totalorder %s2150_s8, %s1877_s10  ;;  %p1881_p0 = scmp.lt.u32.totalorder %s1877_s10, %s2150_s8 }
 0x43a   :  { %p1883_p1 = pnand %p1881_p0, %p1878_p13 }
 0x43c   :  { %1886 = shalt.err (!%p1883_p1)
}
 0x43d   :  { %1379 = dma.vmem_to_hbm [thread:$0]  %s1377_s27, 128, %s2150_s8, [#allocation5]   ;;  %vm1362_vm7 = vcmp.eq.s32.totalorder %v2094_v21, 2  ;;  %vm1361_vm8 = vcmp.eq.s32.totalorder %v2094_v21, 1  ;;  %vm1360_vm9 = vcmp.eq.s32.totalorder %v2094_v21, 0 }
 0x43e   :  { %s1922_s0 = smov [#allocation7]  }
 0x43f   :  { %s1386_s21 = sshll.u32 %s1922_s0, 4  ;;  %s1387_s21 = int_to_ptr.vmem [resolvable:$true] %s1386_s21 }
 0x440   :  { %s1887_s8 = scalar_lea.vmem %s1387_s21, 16  ;;  %s1891_s22 = scalar_lea.vmem %s1387_s21, 32 }
 0x441   :  { %p1888_p2 = scmp.ne.s32.totalorder %s1387_s21, %s1887_s8  ;;  %p1892_p3 = scmp.lt.s32.totalorder %s1387_s21, %s1387_s21 }
 0x442   :  { %p1893_p4 = scmp.lt.s32.totalorder %s1891_s22, %s1887_s8 }
 0x444   :  { %p1894_p5 = por %p1893_p4, %p1892_p3 }
 0x446   :  { %p1895_p6 = pnand %p1894_p5, %p1888_p2 }
 0x455   :  { %s1606_s17 = spop %1605 }
 0x456   :  { %s1288_s18 = ssub.f32 0.0, %s1606_s17 }
 0x458   :  { %v1365_v37 = vstv %s1288_s18 }
 0x466   :  { %s1608_s19 = spop %1607 }
 0x467   :  { %v1367_v39 = vstv %s1608_s19 }
 0x491   :  { %v1352_v18 = vpop.xlane.xlu0 %1351 }
 0x492   :  { %v1353_v30 = vrot.slane %v1352_v18, 4 }
 0x494   :  { %v1354_v31 = vadd.f32 %v1353_v30, %v1352_v18 }
 0x496   :  { %v1355_v32 = vrot.slane %v1354_v31, 2 }
 0x498   :  { %v1356_v33 = vadd.f32 %v1355_v32, %v1354_v31 }
 0x49a   :  { %v1357_v34 = vrot.slane %v1356_v33, 1 }
 0x49c   :  { %v1358_v35 = vadd.f32 %v1357_v34, %v1356_v33 }
 0x49e   :  { %1609 = vpush %v1358_v35 }
 0x4cf   :  { %s1610_s20 = spop %1609 }
 0x4d0   :  { %v1363_v36 = vstv %s1610_s20 }
 0x4d1   :  { %v1364_v38 = vsel %vm1362_vm7, %v1363_v36, 0.0 }
 0x4d2   :  { %v1366_v40 = vsel %vm1361_vm8, %v1365_v37, %v1364_v38 }
 0x4d3   :  { %v1368_v41 = vsel %vm1360_vm9, %v1367_v39, %v1366_v40 }
 0x4d4   :  { %1369 = vst [vmem:[#allocation7] sm:$0x1] %v1368_v41 }
 0x4d5   :  { %1898 = shalt.err (!%p1895_p6)
}
 0x4d6   :  { %s1899_s3 = scalar_lea.hbm %s2151_s9, 16 }
 0x4d7   :  { %p1900_p7 = scmp.ne.s32.totalorder %s2151_s9, %s1899_s3  ;;  %p1903_p8 = scmp.lt.u32.totalorder %s1899_s3, %s2151_s9 }
 0x4d9   :  { %p1905_p9 = pnand %p1903_p8, %p1900_p7 }
 0x4db   :  { %1908 = shalt.err (!%p1905_p9)
}
 0x4dc   :  { %1389 = dma.vmem_to_hbm [thread:$0]  %s1387_s21, 16, %s2151_s9, [#allocation8]  }
 0x4dd   :  { %1911 = dma.done.wait [#allocation5], 128  }
 0x4de   :  { %1912 = vsyncadd [#allocation5], 4294967168 }
 0x4df   :  { %1913 = dma.done.wait [#allocation8], 16  }
 0x4e0   :  { %1914 = vsyncadd [#allocation8], 4294967280 }
 0x4e1   :  { %1396 = vsyncpa [#allocation4], 1 }
 0x4e2   :  { %1397 = vsyncpa [#allocation5], 1 }
 0x4e3   :  { %1398 = vsyncpa [#allocation8], 1 }

</bundles_post_ra>
